<compile_context>
chip_gen: v5e
topology: v5e:2x2
jax: 0.10.0
libtpu: 0.0.40
codegen_flags: <defaults>
</compile_context>

<pallas_src>
import jax
import jax.numpy as jnp
from jax.experimental import pallas as pl
from jax.experimental.pallas import tpu as pltpu

_MIB = 1024 * 1024


def _masked_softmax_kernel(x_ref, m_ref, o_ref):
    x = x_ref[...].astype(jnp.float32)                 # (tb, N), widened in-kernel
    valid = m_ref[...] != 0                            # (tb, N) bool, any numeric mask dtype

    # max over the masked row (masked slots -> -inf), no persistent x_masked temp.
    x_max = jnp.max(jnp.where(valid, x, -jnp.inf), axis=1, keepdims=True)
    # exp(x - max) zeroed at masked slots (== reference's `exp * mask`, but via select).
    x_exp = jnp.where(valid, jnp.exp(x - x_max), 0.0)

    denom = jnp.sum(x_exp, axis=1, keepdims=True)
    inv = 1.0 / denom                                   # exact; only a (tb, 1) column
    o_ref[...] = (x_exp * inv).astype(o_ref.dtype)


def _softmax_kernel(x_ref, o_ref):
    x = x_ref[...].astype(jnp.float32)
    x_max = jnp.max(x, axis=1, keepdims=True)
    x_exp = jnp.exp(x - x_max)
    denom = jnp.sum(x_exp, axis=1, keepdims=True)
    inv = 1.0 / denom
    o_ref[...] = (x_exp * inv).astype(o_ref.dtype)


def _vmem_limit_bytes():
    """Scoped VMEM limit with headroom; generation-aware fallback so v5e/v6e
    (128 MiB) are not clamped to v7x (64 MiB per TC) budgets."""
    try:
        phys = int(pltpu.get_tpu_info().vmem_capacity_bytes)
    except Exception:
        kind = ""
        try:
            kind = jax.devices()[0].device_kind.lower()
        except Exception:
            pass
        phys = 64 * _MIB if "v7" in kind else 128 * _MIB
    return int(min(max(phys - 16 * _MIB, 32 * _MIB), 100 * _MIB))


def _pick_tb(B, N, itemsizes, tile_budget):
    """Largest sublane-aligned row tile that fits the double-buffered pipeline
    working set plus f32 temporaries in `tile_budget`, while keeping >= ~8 grid
    steps for non-tiny batches (megacore sharding + pipelining)."""
    # 2x pipeline buffers for every operand + ~3 (tb, N) f32 temporaries.
    per_row = 2 * N * sum(itemsizes) + 3 * N * 4
    min_item = min(itemsizes)
    align = 8 if min_item >= 4 else (16 if min_item == 2 else 32)
    if B <= align:
        return B  # full-dim block (always a legal block shape)
    cap = max(tile_budget // per_row, align)
    cap = min(cap, 2048, B)
    # Keep at least ~8 grid steps when B allows it (v7x: 2 TCs + pipelining).
    cap = min(cap, max(pl.cdiv(B, 8), align))
    tb = (cap // align) * align
    return max(tb, align)


def masked_softmax(x, mask=None, *, tb=None):
    """x: [B, N] (f32/bf16/...); mask: optional [B, N] 0/1 (int8/float/bool).
    Returns softmax over axis=1 in x.dtype, matching MaskedSoftmax.forward."""
    B, N = x.shape
    if mask is not None:
        assert mask.shape == (B, N)
        if mask.dtype == jnp.bool_:
            # Prefer producers that hand us int8 directly (this cast is an
            # extra HBM pass over the mask).
            mask = mask.astype(jnp.int8)

    vmem_limit = _vmem_limit_bytes()
    itemsizes = [x.dtype.itemsize, x.dtype.itemsize]      # x in + out
    if mask is not None:
        itemsizes.append(mask.dtype.itemsize)
    if tb is None:
        tb = _pick_tb(B, N, itemsizes, int(vmem_limit * 0.7))
    tb = min(tb, B)

    grid = (pl.cdiv(B, tb),)                              # partial last block is masked
    row_spec = pl.BlockSpec((tb, N), lambda i: (i, 0))
    out_shape = jax.ShapeDtypeStruct((B, N), x.dtype)

    compiler_params = pltpu.CompilerParams(
        dimension_semantics=("parallel",),
        vmem_limit_bytes=vmem_limit,
    )
    cost_estimate = pl.CostEstimate(
        flops=5 * B * N,
        transcendentals=B * N,
        bytes_accessed=B * N * sum(itemsizes),
    )

    if mask is None:
        return pl.pallas_call(
            _softmax_kernel,
            out_shape=out_shape,
            grid_spec=pltpu.PrefetchScalarGridSpec(
                num_scalar_prefetch=0,
                grid=grid,
                in_specs=[row_spec],
                out_specs=row_spec,
            ),
            compiler_params=compiler_params,
            cost_estimate=cost_estimate,
        )(x)

    return pl.pallas_call(
        _masked_softmax_kernel,
        out_shape=out_shape,
        grid_spec=pltpu.PrefetchScalarGridSpec(
            num_scalar_prefetch=0,
            grid=grid,
            in_specs=[row_spec, row_spec],
            out_specs=row_spec,
        ),
        compiler_params=compiler_params,
        cost_estimate=cost_estimate,
    )(x, mask)


def _reference(x, mask=None):
    # Pure-JAX port of the PyTorch forward, for the correctness check.
    x = x.astype(jnp.float32)
    if mask is not None:
        m = mask.astype(jnp.float32)
        x_masked = x * m + (1.0 - 1.0 / m)
    else:
        x_masked = x
    x_max = jnp.max(x_masked, axis=1, keepdims=True)
    x_exp = jnp.exp(x - x_max)
    if mask is not None:
        x_exp = x_exp * mask.astype(jnp.float32)
    return x_exp / jnp.sum(x_exp, axis=1, keepdims=True)


if __name__ == "__main__":
    key = jax.random.PRNGKey(0)
    kx, km, kx2, km2 = jax.random.split(key, 4)

    B, N = 64, 256  # small [batch_size, num_items]
    x = jax.random.normal(kx, (B, N), dtype=jnp.float32)

    # Deterministic 0/1 mask as int8; first column forced to 1 so every row has
    # at least one unmasked item (fully-masked rows are NaN, as in PyTorch).
    mask = (jax.random.uniform(km, (B, N)) > 0.3).astype(jnp.int8)
    mask = mask.at[:, 0].set(1)

    out_masked = jax.block_until_ready(masked_softmax(x, mask))
    out_plain = jax.block_until_ready(masked_softmax(x, None))
    # float mask dtype path + explicit small row tile (multi-step grid).
    out_tiled = jax.block_until_ready(
        masked_softmax(x, mask.astype(jnp.float32), tb=16))

    ref_masked = _reference(x, mask)
    ref_plain = _reference(x, None)

    assert jnp.allclose(out_masked, ref_masked, atol=1e-5, rtol=1e-5)
    assert jnp.allclose(out_plain, ref_plain, atol=1e-5, rtol=1e-5)
    assert jnp.allclose(out_tiled, ref_masked, atol=1e-5, rtol=1e-5)

    # Batch that is not a multiple of the auto-picked tile -> cdiv grid with a
    # partial (masked) last block.
    B2 = 40
    x2 = jax.random.normal(kx2, (B2, N), dtype=jnp.float32)
    mask2 = (jax.random.uniform(km2, (B2, N)) > 0.3).astype(jnp.int8)
    mask2 = mask2.at[:, 0].set(1)
    out_partial = jax.block_until_ready(masked_softmax(x2, mask2))
    assert jnp.allclose(out_partial, _reference(x2, mask2), atol=1e-5, rtol=1e-5)

    # Native bf16 input path (widened to f32 inside the kernel, bf16 out).
    x_bf16 = x.astype(jnp.bfloat16)
    out_bf16 = jax.block_until_ready(masked_softmax(x_bf16, mask))
    assert jnp.allclose(out_bf16.astype(jnp.float32), _reference(x_bf16, mask),
                        atol=2e-2, rtol=2e-2)

    print("KERNEL_OK")
</pallas_src>

<mosaic_0001>
module attributes {stable_mosaic.version = 11 : i64} {
  func.func @_masked_softmax_kernel(%arg0: i32, %arg1: memref<32x256xf32, #tpu.memory_space<vmem>>, %arg2: memref<32x256xi8, #tpu.memory_space<vmem>>, %arg3: memref<32x256xf32, #tpu.memory_space<vmem>>) attributes {dimension_semantics = [#tpu.dimension_semantics<parallel>], iteration_bounds = array<i64: 2>, scalar_prefetch = 0 : i64, scratch_operands = 0 : i64, tpu.core_type = #tpu.core_type<tc>, window_params = [{transform_indices = @transform_0, window_bounds = array<i64: 32, 256>}, {transform_indices = @transform_1, window_bounds = array<i64: 32, 256>}, {transform_indices = @transform_2, window_bounds = array<i64: 32, 256>}]} {
    %c0 = arith.constant 0 : index
    %c0_0 = arith.constant 0 : index
    %0 = vector.load %arg1[%c0, %c0_0] : memref<32x256xf32, #tpu.memory_space<vmem>>, vector<32x256xf32>
    %c0_1 = arith.constant 0 : index
    %c0_2 = arith.constant 0 : index
    %1 = vector.load %arg2[%c0_1, %c0_2] : memref<32x256xi8, #tpu.memory_space<vmem>>, vector<32x256xi8>
    %c0_i8 = arith.constant 0 : i8
    %2 = vector.broadcast %c0_i8 : i8 to vector<32x256xi8>
    %3 = arith.cmpi ne, %1, %2 : vector<32x256xi8>
    %cst = arith.constant 0xFF800000 : f32
    %4 = vector.broadcast %cst : f32 to vector<32x256xf32>
    %5 = arith.select %3, %0, %4 : vector<32x256xi1>, vector<32x256xf32>
    %cst_3 = arith.constant dense<0xFF800000> : vector<32xf32>
    %6 = vector.multi_reduction <maximumf>, %5, %cst_3 [1] : vector<32x256xf32> to vector<32xf32>
    %7 = vector.shape_cast %6 : vector<32xf32> to vector<32x1xf32>
    %8 = vector.broadcast %7 : vector<32x1xf32> to vector<32x256xf32>
    %9 = arith.subf %0, %8 : vector<32x256xf32>
    %10 = math.exp %9 : vector<32x256xf32>
    %cst_4 = arith.constant 0.000000e+00 : f32
    %11 = vector.broadcast %cst_4 : f32 to vector<32x256xf32>
    %12 = arith.select %3, %10, %11 : vector<32x256xi1>, vector<32x256xf32>
    %cst_5 = arith.constant dense<0.000000e+00> : vector<32xf32>
    %13 = vector.multi_reduction <add>, %12, %cst_5 [1] : vector<32x256xf32> to vector<32xf32>
    %14 = vector.shape_cast %13 : vector<32xf32> to vector<32x1xf32>
    %cst_6 = arith.constant 1.000000e+00 : f32
    %15 = vector.broadcast %cst_6 : f32 to vector<32x1xf32>
    %16 = arith.divf %15, %14 : vector<32x1xf32>
    %17 = vector.broadcast %16 : vector<32x1xf32> to vector<32x256xf32>
    %18 = arith.mulf %12, %17 : vector<32x256xf32>
    %c0_7 = arith.constant 0 : index
    %c0_8 = arith.constant 0 : index
    %19 = vector.load %arg3[%c0_7, %c0_8] : memref<32x256xf32, #tpu.memory_space<vmem>>, vector<32x256xf32>
    tpu.vector_store %arg3[%c0_7, %c0_8], %18 {strides = array<i32>} : memref<32x256xf32, #tpu.memory_space<vmem>>, vector<32x256xf32>,
    return
  }
  func.func @transform_0(%arg0: i32) -> (i32, i32) {
    %c0_i32 = arith.constant 0 : i32
    %c0_i32_0 = arith.constant 0 : i32
    return %arg0, %c0_i32 : i32, i32
  }
  func.func @transform_1(%arg0: i32) -> (i32, i32) {
    %c0_i32 = arith.constant 0 : i32
    %c0_i32_0 = arith.constant 0 : i32
    return %arg0, %c0_i32 : i32, i32
  }
  func.func @transform_2(%arg0: i32) -> (i32, i32) {
    %c0_i32 = arith.constant 0 : i32
    %c0_i32_0 = arith.constant 0 : i32
    return %arg0, %c0_i32 : i32, i32
  }
}

</mosaic_0001>

<bundles_post_ra>
// kernel: tpu_custom_call.1
= control target key start
LH: loop header
LB: loop body
LE: loop exit
PB: predicated region body
PF: predicated region fallthrough
CT: control target
= control target key end

     0   :  { %7 = vsyncpa [#allocation3], 0  ;;  %s1060_s0 = inlined_call_operand.hbm [shape: f32[64,256], index: 0, kind: input, shape index: {}]   ;;  %s1061_s1 = inlined_call_operand.hbm [shape: s8[64,256], index: 1, kind: input, shape index: {}]   ;;  %s1062_s2 = inlined_call_operand.hbm [shape: f32[64,256], index: 2, kind: output, shape index: {}]  }
   0x1   :  { %9 = vsyncpa [#allocation3 + $0x1], 0 }
   0x2   :  { %10 = vsyncpa [#allocation6], 0 }
   0x3   :  { %12 = vsyncpa [#allocation6 + $0x1], 0 }
   0x4   :  { %13 = vsyncpa [#allocation4], 0 }
   0x5   :  { %15 = vsyncpa [#allocation4 + $0x1], 0  ;;  %s773_s9 = smov 0   ;;  %s775_s10 = smov 0  }
   0x6   :  { %s777_s11 = smov 0   ;;  %s779_s12 = smov 0  }
   0x7 LB: > { %s794_s13 = sadd.s32 4294967295, %s751_s12   ;;  %s516_s14 = sadd.s32 4294967294, %s751_s12   ;;  %s751_s12 = sphi %s779_s12, %s1089_s12   ;;  %s747_s11 = sphi %s777_s11, %s1088_s11   ;;  %s743_s10 = sphi %s775_s10, %s1087_s10   ;;  %s739_s9 = sphi %s773_s9, %s1086_s9  }
   0x8   : > { %s798_s15 = sadd.s32 1, %s751_s12   ;;  %s28_s16 = sadd.s32 1, %s747_s11 }
   0x9   : > { %s25_s17 = ssub.s32 %s751_s12, %s798_s15  ;;  %p35_p0 = scmp.ne.s32.totalorder %s747_s11, %s743_s10 }
   0xa   : > { %p26_p1 = scmp.eq.s32.totalorder %s25_s17, 0  ;;  %p36_p2 = scmp.eq.s32.totalorder %s751_s12, 0 }
   0xb   : > { %p41_p3 = scmp.ne.s32.totalorder %s743_s10, %s739_s9  ;;  %p42_p4 = scmp.eq.s32.totalorder %s794_s13, 0 }
   0xc   : > { %s810_s18 = scalar_select %p26_p1, %s747_s11, %s28_s16  }
   0xd   : > { %p812_p5 = por %p36_p2, %p35_p0  ;;  %p816_p6 = por %p42_p4, %p41_p3 }
   0xe   : > { %p91_p7 = scmp.eq.s32.totalorder %s794_s13, 1  ;;  %p97_p8 = scmp.eq.s32.totalorder %s516_s14, 1 }
   0xf   : > { %p558_p10 = scmp.lt.s32.totalorder %s751_s12, 2  ;;  %s832_s23 = sand.u32 1, %s747_s11  }
  0x10   : > { %p823_p11 = por %p91_p7, %p35_p0  ;;  %p827_p12 = por %p97_p8, %p41_p3 }
  0x11   : > { %s537_s24 = sshll.u32 %s751_s12, 6  ;;  %s519_s25 = sshll.u32 %s832_s23, 6 }
  0x12   : > { %s127_s28 = scalar_lea.hbm %s1060_s0, %s537_s24  ;;  %s121_s30 = scalar_lea.vmem [#allocation2], %s519_s25 }
  0x13   : > { %s128_s29 = sshll.u32 %s127_s28, 4  ;;  %s130_s3 = sshll.u32 %s121_s30, 4  ;;  %s129_s29 = int_to_ptr.hbm [resolvable:$true] %s128_s29  ;;  %s131_s3 = int_to_ptr.vmem [resolvable:$true] %s130_s3 }
  0x14   : > { %p841_p13 = pnand %p558_p10, %p812_p5  ;;  %p526_p0 = scmp.ge.s32.totalorder %s751_s12, 1 }
  0x15   : > { %p158_p1 = scmp.lt.s32.totalorder %s751_s12, 3  ;;  %s118_s5 = scalar_lea.sflag [#allocation3], %s832_s23 }
  0x16   : > { %s621_s6 = sshra.s32 %s129_s29, 4  ;;  %p625_p3 = pneg %p841_p13  ;;  %s622_s6 = int_to_ptr.hbm [resolvable:$true] %s621_s6 }
  0x17   : > { %s623_s7 = scalar_lea.hbm %s622_s6, 64  ;;  %s628_s16 = scalar_lea.hbm %s1060_s0, 128 }
  0x18   : > { %p624_p2 = scmp.ne.s32.totalorder %s622_s6, %s623_s7  ;;  %p629_p5 = scmp.lt.s32.totalorder %s622_s6, %s1060_s0 }
  0x19   : > { %p630_p8 = scmp.lt.s32.totalorder %s628_s16, %s623_s7 }
  0x1a   : > { %p626_p4 = pnand %p625_p3, %p624_p2 }
  0x1b   : > { %p631_p10 = por %p630_p8, %p629_p5 }
  0x1c   : > { %p627_p7 = pneg %p626_p4 }
  0x1e   : > { %p632_p9 = pnand %p631_p10, %p627_p7 }
  0x20   : > { %635 = shalt.err (!%p632_p9)
}
  0x21   : > { %s753_s24 = smov 256   ;;  %s754_s25 = smov 16  }
  0x22   : > { %550 = dma.hbm_to_vmem [thread:$0]  (!%p841_p13), %s129_s29, 1024, %s131_s3, %s118_s5, %s753_s24, %s753_s24, %s754_s25  }
  0x23   : > { %p865_p2 = pnand %p526_p0, %p158_p1  ;;  %s523_s27 = sshll.u32 %s832_s23, 4 }
  0x24   : > { %s538_s28 = sshll.u32 %s751_s12, 4  ;;  %s144_s14 = scalar_lea.vmem [#allocation5], %s523_s27 }
  0x25   : > { %s149_s7 = scalar_lea.hbm %s1061_s1, %s538_s28  ;;  %s153_s16 = sshll.u32 %s144_s14, 4  ;;  %s154_s16 = int_to_ptr.vmem [resolvable:$true] %s153_s16 }
  0x26   : > { %s151_s8 = sshll.u32 %s149_s7, 4  ;;  %s141_s17 = scalar_lea.sflag [#allocation6], %s832_s23  ;;  %s152_s8 = int_to_ptr.hbm [resolvable:$true] %s151_s8 }
  0x27   : > { %s651_s19 = sshra.s32 %s152_s8, 4  ;;  %s658_s24 = scalar_lea.hbm %s1061_s1, 32  ;;  %s652_s19 = int_to_ptr.hbm [resolvable:$true] %s651_s19 }
  0x28   : > { %s653_s29 = scalar_lea.hbm %s652_s19, 16  ;;  %p659_p4 = scmp.lt.s32.totalorder %s652_s19, %s1061_s1 }
  0x29   : > { %p654_p9 = scmp.ne.s32.totalorder %s652_s19, %s653_s29  ;;  %p660_p7 = scmp.lt.s32.totalorder %s658_s24, %s653_s29 }
  0x2b   : > { %p656_p0 = pnand %p654_p9, %p625_p3  ;;  %p661_p5 = por %p660_p7, %p659_p4 }
  0x2d   : > { %p657_p1 = pneg %p656_p0 }
  0x2f   : > { %p662_p8 = pnand %p661_p5, %p657_p1 }
  0x31   : > { %665 = shalt.err (!%p662_p8)
}
  0x32   : > { %553 = dma.hbm_to_vmem [thread:$0]  (!%p841_p13), %s152_s8, 256, %s154_s16, %s141_s17  }
  0x33   : > { %162 = sbr.rel (%p865_p2) target bundleno = 359 (0x167), region = 28  ;;  %s889_s23 = sand.u32 (!%p865_p2), 1, %s743_s10  }
  0x34   : > { %s527_s27 = sshll.u32 (!%p865_p2), %s889_s23, 6  ;;  %s165_s30 = scalar_lea.sflag (!%p865_p2), [#allocation3], %s889_s23 }
  0x35   : > { %s895_s6 = scalar_lea.vmem (!%p865_p2), [#allocation2], %s527_s27 }
  0x38   : > { %726 = dma.done.wait (%p816_p6), %s165_s30, 1024  }
  0x39   : > { %728 = vsyncadd (%p816_p6), %s165_s30, 4294966272  ;;  %s528_s4 = sshll.u32 %s889_s23, 4  ;;  %s175_s26 = scalar_lea.sflag [#allocation6], %s889_s23 }
  0x3a   : > { %s178_s7 = scalar_lea.vmem [#allocation5], %s528_s4 }
  0x3b   : > { %730 = dma.done.wait (%p816_p6), %s175_s26, 256  }
  0x3c   : > { %732 = vsyncadd (%p816_p6), %s175_s26, 4294967040  ;;  %v217_v0 = vld [vmem:[%s178_s7] sm:$0xff]  ;;  %v218_v1 = vld [vmem:[%s178_s7 + $0x8] sm:$0xff]  ;;  %v755_v2 = vmov 0   ;;  %s1009_s20 = scalar_lea.vmem [#allocation7], %s527_s27  ;;  %s540_s8 = sshll.u32 %s794_s13, 6 }
  0x3d   : > { %vm219_vm0 = vnez %v217_v0  ;;  %vm220_vm1 = vnez %v218_v1  ;;  %v213_v21 = vld [vmem:[%s895_s6 + $0x20] sm:$0xff]  ;;  %v214_v25 = vld [vmem:[%s895_s6 + $0x28] sm:$0xff]  ;;  %v215_v45 = vld [vmem:[%s895_s6 + $0x30] sm:$0xff]  ;;  %s416_s13 = scalar_lea.hbm %s1062_s2, %s540_s8  ;;  %s417_s17 = sshll.u32 %s1009_s20, 4  ;;  %s418_s17 = int_to_ptr.vmem [resolvable:$true] %s417_s17 }
  0x3e   : > { %v221_v3 = vsel %vm219_vm0, 16843009, %v755_v2  ;;  %v222_v4 = vsel %vm220_vm1, 16843009, %v755_v2  ;;  %v209_v28 = vld [vmem:[%s895_s6] sm:$0xff]  ;;  %v210_v29 = vld [vmem:[%s895_s6 + $0x8] sm:$0xff] }
  0x3f   : > { %v227_v5 = vunpack.c.2.s8 %v221_v3  ;;  %v223_v6 = vunpack.c.0.s8 %v221_v3  ;;  %v229_v7 = vunpack.c.3.s8 %v221_v3  ;;  %v228_v8 = vunpack.c.2.s8 %v222_v4  ;;  %v216_v46 = vld [vmem:[%s895_s6 + $0x38] sm:$0xff]  ;;  %v211_v49 = vld [vmem:[%s895_s6 + $0x10] sm:$0xff]  ;;  %s419_s19 = sshll.u32 %s416_s13, 4  ;;  %s404_s29 = scalar_lea.sflag [#allocation4], %s889_s23  ;;  %s420_s19 = int_to_ptr.hbm [resolvable:$true] %s419_s19 }
  0x40   : > { %v224_v9 = vunpack.c.0.s8 %v222_v4  ;;  %v230_v10 = vunpack.c.3.s8 %v222_v4  ;;  %v225_v11 = vunpack.c.1.s8 %v221_v3  ;;  %v226_v12 = vunpack.c.1.s8 %v222_v4  ;;  %v212_v50 = vld [vmem:[%s895_s6 + $0x18] sm:$0xff]  ;;  %s695_s3 = sshra.s32 %s420_s19, 4  ;;  %s701_s28 = scalar_lea.hbm %s1062_s2, 128  ;;  %s696_s3 = int_to_ptr.hbm [resolvable:$true] %s695_s3 }
  0x41   : > { %v235_v13 = vpack.c.b16 %v228_v8, %v227_v5  ;;  %s697_s5 = scalar_lea.hbm %s696_s3, 64  ;;  %p702_p10 = scmp.lt.s32.totalorder %s696_s3, %s1062_s2 }
  0x42   : > { %v231_v14 = vpack.c.b16 %v224_v9, %v223_v6  ;;  %v237_v15 = vpack.c.b16 %v230_v10, %v229_v7  ;;  %v233_v16 = vpack.c.b16 %v226_v12, %v225_v11  ;;  %p698_p6 = scmp.ne.s32.totalorder %s696_s3, %s697_s5  ;;  %p703_p2 = scmp.lt.s32.totalorder %s701_s28, %s697_s5 }
  0x43   : > { %v236_v17 = vpack.c.b8 %v235_v13, %v235_v13 }
  0x44   : > { %v232_v18 = vpack.c.b8 %v231_v14, %v231_v14  ;;  %v238_v19 = vpack.c.b8 %v237_v15, %v237_v15  ;;  %v234_v20 = vpack.c.b8 %v233_v16, %v233_v16  ;;  %p699_p13 = pnand %p698_p6, %p823_p11  ;;  %p704_p9 = por %p703_p2, %p702_p10 }
  0x45   : > { %vm241_vm2 = vnez %v236_v17 }
  0x46   : > { %vm239_vm3 = vnez %v232_v18  ;;  %vm242_vm4 = vnez %v238_v19  ;;  %v245_v22 = vsel %vm241_vm2, 16843009, %v755_v2  ;;  %vm240_vm5 = vnez %v234_v20  ;;  %p700_p3 = pneg %p699_p13 }
  0x47   : > { %v243_v23 = vsel %vm239_vm3, 16843009, %v755_v2  ;;  %v246_v24 = vsel %vm242_vm4, 16843009, %v755_v2  ;;  %v251_v26 = vunpack.c.0.s8 %v245_v22  ;;  %v252_v27 = vunpack.c.1.s8 %v245_v22 }
  0x48   : > { %v247_v30 = vunpack.c.0.s8 %v243_v23  ;;  %v248_v31 = vunpack.c.1.s8 %v243_v23  ;;  %v253_v32 = vunpack.c.0.s8 %v246_v24  ;;  %v254_v33 = vunpack.c.1.s8 %v246_v24  ;;  %p705_p0 = pnand %p704_p9, %p700_p3 }
  0x49   : > { %v244_v34 = vsel %vm240_vm5, 16843009, %v755_v2  ;;  %vm911_vm6 = vcmp.ne.s32.totalorder %v251_v26, 0  ;;  %vm915_vm7 = vcmp.ne.s32.totalorder %v252_v27, 0 }
  0x4a   : > { %vm919_vm8 = vcmp.ne.s32.totalorder %v247_v30, 0  ;;  %vm923_vm9 = vcmp.ne.s32.totalorder %v248_v31, 0  ;;  %v267_v39 = vsel %vm911_vm6, %v213_v21, -inf  ;;  %v268_v40 = vsel %vm915_vm7, %v214_v25, -inf }
  0x4b   : > { %v263_v41 = vsel %vm919_vm8, %v209_v28, -inf  ;;  %v264_v42 = vsel %vm923_vm9, %v210_v29, -inf  ;;  %v277_v43 = vmax.f32 %v267_v39, %v268_v40  ;;  %vm937_vm10 = vcmp.ne.s32.totalorder %v253_v32, 0 }
  0x4c   : > { %v271_v44 = vmax.f32 %v263_v41, %v264_v42  ;;  %vm941_vm11 = vcmp.ne.s32.totalorder %v254_v33, 0  ;;  %v249_v51 = vunpack.c.0.s8 %v244_v34  ;;  %v250_v52 = vunpack.c.1.s8 %v244_v34 }
  0x4d   : > { %278 = vmax.xlane.f32.xlu1 %v277_v43  ;;  %v269_v53 = vsel %vm937_vm10, %v215_v45, -inf  ;;  %v270_v54 = vsel %vm941_vm11, %v216_v46, -inf }
  0x4e   : > { %272 = vmax.xlane.f32.xlu0 %v271_v44  ;;  %vm951_vm12 = vcmp.ne.s32.totalorder %v249_v51, 0  ;;  %vm955_vm13 = vcmp.ne.s32.totalorder %v250_v52, 0  ;;  %v280_v59 = vmax.f32 %v269_v53, %v270_v54 }
  0x4f   : > { %v265_v57 = vsel %vm951_vm12, %v211_v49, -inf  ;;  %v266_v58 = vsel %vm955_vm13, %v212_v50, -inf }
  0x50   : > { %v274_v60 = vmax.f32 %v265_v57, %v266_v58 }
  0x55   : > { %281 = vmax.xlane.f32.xlu1 %v280_v59 }
  0x56   : > { %275 = vmax.xlane.f32.xlu0 %v274_v60 }
  0xc0   : > { %v279_v61 = vpop.xlane.xlu1 %278 }
  0xc1   : > { %v273_v62 = vpop.xlane.xlu0 %272  ;;  %v287_v63 = vsub.f32 %v213_v21, %v279_v61  ;;  %v288_v0 = vsub.f32 %v214_v25, %v279_v61 }
  0xc2   : > { %v283_v1 = vsub.f32 %v209_v28, %v273_v62  ;;  %v284_v2 = vsub.f32 %v210_v29, %v273_v62 }
  0xc3   : > { %v299_v3 = vmul.f32 1.442695, %v287_v63  ;;  %v301_v4 = vmul.f32 1.442695, %v288_v0 }
  0xc4   : > { %v291_v5 = vmul.f32 1.442695, %v283_v1  ;;  %v293_v6 = vmul.f32 1.442695, %v284_v2 }
  0xc5   : > { %597 = vpow2.f32 %v299_v3 }
  0xc6   : > { %599 = vpow2.f32 %v301_v4 }
  0xc7   : > { %601 = vpow2.f32 %v291_v5 }
  0xc8   : > { %603 = vpow2.f32 %v293_v6  ;;  %v282_v7 = vpop.xlane.xlu1 %281 }
  0xc9   : > { %v276_v8 = vpop.xlane.xlu0 %275  ;;  %v289_v9 = vsub.f32 %v215_v45, %v282_v7  ;;  %v290_v10 = vsub.f32 %v216_v46, %v282_v7 }
  0xca   : > { %v285_v11 = vsub.f32 %v211_v49, %v276_v8  ;;  %v286_v12 = vsub.f32 %v212_v50, %v276_v8 }
  0xcb   : > { %v598_v13 = vpop.eup %597  ;;  %v303_v14 = vmul.f32 1.442695, %v289_v9  ;;  %v305_v15 = vmul.f32 1.442695, %v290_v10 }
  0xcc   : > { %v295_v16 = vmul.f32 1.442695, %v285_v11  ;;  %v600_v17 = vpop.eup %599  ;;  %v297_v18 = vmul.f32 1.442695, %v286_v12  ;;  %v965_v19 = vsel %vm911_vm6, %v598_v13, 0.0 }
  0xcd   : > { %v602_v20 = vpop.eup %601  ;;  %605 = vpow2.f32 %v303_v14  ;;  %v312_v21 = vsel %vm915_vm7, %v600_v17, 0.0 }
  0xce   : > { %v604_v22 = vpop.eup %603  ;;  %607 = vpow2.f32 %v305_v15  ;;  %v321_v23 = vadd.f32 %v312_v21, %v965_v19  ;;  %v972_v24 = vsel %vm919_vm8, %v602_v20, 0.0 }
  0xcf   : > { %609 = vpow2.f32 %v295_v16  ;;  %v976_v25 = vsel %vm923_vm9, %v604_v22, 0.0 }
  0xd0   : > { %611 = vpow2.f32 %v297_v18  ;;  %322 = vadd.xlane.f32.xlu0 %v321_v23  ;;  %v315_v26 = vadd.f32 %v976_v25, %v972_v24 }
  0xd2   : > { %316 = vadd.xlane.f32.xlu2 %v315_v26 }
  0xd3   : > { %v606_v27 = vpop.eup %605 }
  0xd4   : > { %v608_v28 = vpop.eup %607  ;;  %v982_v29 = vsel %vm937_vm10, %v606_v27, 0.0 }
  0xd5   : > { %v610_v30 = vpop.eup %609  ;;  %v986_v31 = vsel %vm941_vm11, %v608_v28, 0.0 }
  0xd6   : > { %v612_v32 = vpop.eup %611  ;;  %v324_v33 = vadd.f32 %v986_v31, %v982_v29  ;;  %v992_v34 = vsel %vm951_vm12, %v610_v30, 0.0 }
  0xd7   : > { %v996_v35 = vsel %vm955_vm13, %v612_v32, 0.0 }
  0xd8   : > { %325 = vadd.xlane.f32.xlu1 %v324_v33  ;;  %v318_v36 = vadd.f32 %v996_v35, %v992_v34 }
  0xda   : > { %319 = vadd.xlane.f32.xlu2 %v318_v36 }
 0x143   : > { %v323_v37 = vpop.xlane.xlu0 %322 }
 0x144   : > { %613 = vrcp.f32 %v323_v37  ;;  %v368_v46 = vand.u32 2147483648, %v323_v37  ;;  %v366_v49 = vand.u32 2147483647, %v323_v37  ;;  %vm362_vm0 = vweird.f32 %v323_v37 }
 0x145   : > { %v317_v38 = vpop.xlane.xlu2 %316 }
 0x146   : > { %615 = vrcp.f32 %v317_v38  ;;  %v336_v50 = vand.u32 2147483647, %v317_v38  ;;  %v338_v51 = vand.u32 2147483648, %v317_v38  ;;  %vm332_vm1 = vweird.f32 %v317_v38 }
 0x147   : > { %v369_v55 = vor.u32 1.1754944e-38, %v368_v46  ;;  %vm367_vm3 = vcmp.eq.f32.partialorder %v366_v49, 8.507059e+37 }
 0x148   : > { %vm337_vm5 = vcmp.eq.f32.partialorder %v336_v50, 8.507059e+37  ;;  %v339_v60 = vor.u32 1.1754944e-38, %v338_v51 }
 0x14a   : > { %v614_v39 = vpop.eup %613 }
 0x14b   : > { %v358_v40 = vmul.f32 %v614_v39, %v323_v37  ;;  %v326_v41 = vpop.xlane.xlu1 %325  ;;  %vm363_vm14 = vweird.f32 %v614_v39 }
 0x14c   : > { %v616_v42 = vpop.eup %615  ;;  %617 = vrcp.f32 %v326_v41  ;;  %vm364_vm2 = vmor %vm362_vm0, %vm363_vm14  ;;  %v381_v3 = vand.u32 2147483647, %v326_v41  ;;  %v383_v4 = vand.u32 2147483648, %v326_v41  ;;  %vm377_vm7 = vweird.f32 %v326_v41 }
 0x14d   : > { %v328_v43 = vmul.f32 %v616_v42, %v317_v38  ;;  %v359_v44 = vsub.f32 1.0, %v358_v40  ;;  %v1000_v45 = vpop.xlane.xlu2 %319  ;;  %vm333_vm15 = vweird.f32 %v616_v42 }
 0x14e   : > { %619 = vrcp.f32 %v1000_v45  ;;  %vm334_vm4 = vmor %vm332_vm1, %vm333_vm15  ;;  %v353_v11 = vand.u32 2147483648, %v1000_v45  ;;  %v384_v12 = vor.u32 1.1754944e-38, %v383_v4  ;;  %v351_v14 = vand.u32 2147483647, %v1000_v45 }
 0x14f   : > { %v329_v47 = vsub.f32 1.0, %v328_v43  ;;  %v360_v48 = vmul.f32 %v614_v39, %v359_v44  ;;  %vm382_vm10 = vcmp.eq.f32.partialorder %v381_v3, 8.507059e+37  ;;  %vm347_vm11 = vweird.f32 %v1000_v45 }
 0x150   : > { %v354_v20 = vor.u32 1.1754944e-38, %v353_v11  ;;  %vm352_vm13 = vcmp.eq.f32.partialorder %v351_v14, 8.507059e+37 }
 0x151   : > { %v330_v52 = vmul.f32 %v616_v42, %v329_v47  ;;  %v361_v53 = vadd.f32 %v614_v39, %v360_v48 }
 0x152   : > { %v618_v54 = vpop.eup %617 }
 0x153   : > { %v331_v56 = vadd.f32 %v616_v42, %v330_v52  ;;  %v365_v57 = vsel %vm364_vm2, %v614_v39, %v361_v53  ;;  %v373_v58 = vmul.f32 %v618_v54, %v326_v41  ;;  %vm378_vm6 = vweird.f32 %v618_v54 }
 0x154   : > { %v620_v59 = vpop.eup %619  ;;  %v370_v61 = vsel %vm367_vm3, %v369_v55, %v365_v57  ;;  %vm379_vm8 = vmor %vm377_vm7, %vm378_vm6 }
 0x155   : > { %v335_v62 = vsel %vm334_vm4, %v616_v42, %v331_v56  ;;  %v391_v63 = vmul.f32 %v370_v61, %v965_v19  ;;  %v392_v0 = vmul.f32 %v370_v61, %v312_v21  ;;  %v374_v1 = vsub.f32 1.0, %v373_v58 }
 0x156   : > { %v340_v2 = vsel %vm337_vm5, %v339_v60, %v335_v62  ;;  %v343_v5 = vmul.f32 %v620_v59, %v1000_v45  ;;  %vm348_vm9 = vweird.f32 %v620_v59 }
 0x157   : > { %v387_v6 = vmul.f32 %v340_v2, %v972_v24  ;;  %v388_v7 = vmul.f32 %v340_v2, %v976_v25  ;;  %399 = vst [vmem:[%s1009_s20 + $0x20] sm:$0xff] %v391_v63  ;;  %v375_v8 = vmul.f32 %v618_v54, %v374_v1  ;;  %vm349_vm12 = vmor %vm347_vm11, %vm348_vm9 }
 0x158   : > { %400 = vst [vmem:[%s1009_s20 + $0x28] sm:$0xff] %v392_v0  ;;  %v344_v9 = vsub.f32 1.0, %v343_v5 }
 0x159   : > { %395 = vst [vmem:[%s1009_s20] sm:$0xff] %v387_v6  ;;  %v376_v10 = vadd.f32 %v618_v54, %v375_v8 }
 0x15a   : > { %396 = vst [vmem:[%s1009_s20 + $0x8] sm:$0xff] %v388_v7  ;;  %v345_v13 = vmul.f32 %v620_v59, %v344_v9 }
 0x15b   : > { %v380_v15 = vsel %vm379_vm8, %v618_v54, %v376_v10 }
 0x15c   : > { %v385_v16 = vsel %vm382_vm10, %v384_v12, %v380_v15  ;;  %v346_v17 = vadd.f32 %v620_v59, %v345_v13 }
 0x15d   : > { %v393_v18 = vmul.f32 %v385_v16, %v982_v29  ;;  %v394_v19 = vmul.f32 %v385_v16, %v986_v31 }
 0x15e   : > { %v350_v21 = vsel %vm349_vm12, %v620_v59, %v346_v17 }
 0x15f   : > { %401 = vst [vmem:[%s1009_s20 + $0x30] sm:$0xff] %v393_v18  ;;  %v355_v22 = vsel %vm352_vm13, %v354_v20, %v350_v21 }
 0x160   : > { %402 = vst [vmem:[%s1009_s20 + $0x38] sm:$0xff] %v394_v19  ;;  %v389_v23 = vmul.f32 %v355_v22, %v992_v34  ;;  %v390_v24 = vmul.f32 %v355_v22, %v996_v35 }
 0x162   : > { %397 = vst [vmem:[%s1009_s20 + $0x10] sm:$0xff] %v389_v23 }
 0x163   : > { %398 = vst [vmem:[%s1009_s20 + $0x18] sm:$0xff] %v390_v24 }
 0x164   : > { %708 = shalt.err (!%p705_p0)
}
 0x165   : > { %s756_s23 = smov 256   ;;  %s757_s6 = smov 16  }
 0x166   : > { %545 = dma.vmem_to_hbm [thread:$0]  (%p823_p11), %s418_s17, 1024, %s420_s19, %s404_s29, %s756_s23, %s756_s23, %s757_s6  }
 0x167 PF: > { %s434_s4 = sand.u32 1, %s739_s9   ;;  %p1085_p1 = scmp.ge.s32.totalorder %s751_s12, 2 }
 0x168   : > { %s435_s26 = scalar_lea.sflag [#allocation4], %s434_s4 }
 0x169   : > { %p555_p4 = pnand %p1085_p1, %p827_p12 }
 0x16b   : > { %p556_p7 = pneg %p555_p4 }
 0x16d   : > { %734 = dma.done.wait (%p556_p7), %s435_s26, 1024  }
 0x16e   : > { %736 = vsyncadd (%p556_p7), %s435_s26, 4294966272  ;;  %p18_p5 = scmp.ge.s32.totalorder %s798_s15, 4   ;;  %s1086_s9 = smov %s743_s10 }
 0x16f   : > { %s1087_s10 = smov %s747_s11  ;;  %s1088_s11 = smov %s810_s18 }
 0x170   : > { %s1089_s12 = smov %s798_s15  ;;  %20 = sbr.rel (!%p18_p5) target bundleno = 7 (0x7), region = 86 }
 0x175   :  { %441 = vsyncpa [#allocation3], 1 }
 0x176   :  { %443 = vsyncpa [#allocation3 + $0x1], 1 }
 0x177   :  { %444 = vsyncpa [#allocation6], 1 }
 0x178   :  { %446 = vsyncpa [#allocation6 + $0x1], 1 }
 0x179   :  { %447 = vsyncpa [#allocation4], 1 }
 0x17a   :  { %449 = vsyncpa [#allocation4 + $0x1], 1 }

</bundles_post_ra>
